<compile_context>
chip_gen: v5e
topology: v5e:2x2
jax: 0.10.0
libtpu: 0.0.40
codegen_flags: <defaults>
</compile_context>

<pallas_src>
import functools

import jax
import jax.numpy as jnp
from jax.experimental import pallas as pl
from jax.experimental.pallas import tpu as pltpu


def _adapter_kernel(x_ref, wd_ref, bd_ref, wu_ref, bu_ref, o_ref):
    # Down-projection: (tm, D) @ (D, H) -> (tm, H), f32 accumulation on MXU.
    h = jnp.dot(x_ref[...], wd_ref[...], preferred_element_type=jnp.float32)
    h = jnp.maximum(h + bd_ref[...], 0.0)            # bias (1,H) bcast + ReLU (VPU)
    # Up-projection: (tm, H) @ (H, D) -> (tm, D), f32 accumulation on MXU.
    y = jnp.dot(h.astype(wu_ref.dtype), wu_ref[...],
                preferred_element_type=jnp.float32)
    o_ref[...] = (y + bu_ref[...]).astype(o_ref.dtype)


def _round_up(x, n):
    return ((x + n - 1) // n) * n


def prepare_adapter_params(w_d, b_d, w_u, b_u):
    """One-time conversion from torch (out, in) layout to kernel (in, out) layout.

    Call outside the hot forward path (e.g. at parameter creation time) so no
    transpose copies are materialized per forward call.
    """
    wd_t = jnp.transpose(w_d)               # (input, hidden)
    wu_t = jnp.transpose(w_u)               # (hidden, input)
    bd = b_d.reshape(1, -1)                 # (1, hidden)
    bu = b_u.reshape(1, -1)                 # (1, input)
    return wd_t, bd, wu_t, bu


@functools.partial(jax.jit, static_argnames=("block_m",))
def bottleneck_linear_adapter(x, wd_t, bd, wu_t, bu, *, block_m=512):
    """x: (..., input_size). wd_t: (input, hidden), wu_t: (hidden, input) (pre-transposed).

    bd: (1, hidden), bu: (1, input).
    block_m: row-tile size; 256-512 for f32, 512-1024 for bf16 inputs.
    """
    orig_shape = x.shape
    input_size = orig_shape[-1]
    hidden_size = wd_t.shape[1]

    x2d = x.reshape(-1, input_size)
    m = x2d.shape[0]
    itemsize = jnp.dtype(x.dtype).itemsize

    # Row tile: multiple of 8 sublanes, no larger than needed for small M, and
    # capped so the 2x double-buffered (x, out) tiles stay within ~16 MiB of
    # VMEM (leaves headroom on v7x, which only has 64 MiB physical per TC).
    bm = min(block_m, _round_up(m, 8))
    vmem_row_cap = (16 * 1024 * 1024) // max(1, 4 * input_size * itemsize)
    bm = min(bm, max(8, vmem_row_cap))
    bm = max(8, (bm // 8) * 8)

    # cdiv grid: no host-side pad of x or slice of the output needed — Pallas
    # masks stores for the trailing partial block (extra rows never written).
    grid = (pl.cdiv(m, bm),)

    # Grid-invariant operands (constant index_map): single-buffered.
    resident = dict(pipeline_mode=pl.Buffered(buffer_count=1))

    out = pl.pallas_call(
        _adapter_kernel,
        out_shape=jax.ShapeDtypeStruct((m, input_size), x.dtype),
        grid_spec=pltpu.PrefetchScalarGridSpec(
            num_scalar_prefetch=0,
            grid=grid,
            in_specs=[
                pl.BlockSpec((bm, input_size), lambda i: (i, 0)),      # x tile
                pl.BlockSpec((input_size, hidden_size),
                             lambda i: (0, 0), **resident),            # W_d^T
                pl.BlockSpec((1, hidden_size),
                             lambda i: (0, 0), **resident),            # b_d
                pl.BlockSpec((hidden_size, input_size),
                             lambda i: (0, 0), **resident),            # W_u^T
                pl.BlockSpec((1, input_size),
                             lambda i: (0, 0), **resident),            # b_u
            ],
            out_specs=pl.BlockSpec((bm, input_size), lambda i: (i, 0)),
        ),
        compiler_params=pltpu.CompilerParams(
            dimension_semantics=("parallel",),       # rows shard over v7x's 2 TCs
            vmem_limit_bytes=64 * 1024 * 1024,       # room for large bm double-buffers
        ),
    )(x2d, wd_t, bd, wu_t, bu)

    return out.reshape(orig_shape)


def _init_linear_params(key, in_features, out_features, dtype=jnp.float32):
    """Deterministic init mimicking torch.nn.Linear defaults (uniform +/- 1/sqrt(in))."""
    k_w, k_b = jax.random.split(key)
    bound = 1.0 / (in_features ** 0.5)
    w = jax.random.uniform(k_w, (out_features, in_features), dtype,
                           minval=-bound, maxval=bound)
    b = jax.random.uniform(k_b, (out_features,), dtype,
                           minval=-bound, maxval=bound)
    return w, b


def _reference(x, w_d, b_d, w_u, b_u):
    h = jnp.maximum(jnp.einsum("...d,hd->...h", x, w_d) + b_d, 0.0)
    return jnp.einsum("...h,dh->...d", h, w_u) + b_u


if __name__ == "__main__":
    # Small toy config consistent with the module; input_size kept a multiple
    # of 128 so the output stores are lane-dense (unmasked vst).
    batch, seq, input_size, hidden_size = 2, 8, 128, 32

    key = jax.random.PRNGKey(0)
    k_x, k_d, k_u = jax.random.split(key, 3)

    x = jax.random.normal(k_x, (batch, seq, input_size), jnp.float32)
    w_d, b_d = _init_linear_params(k_d, input_size, hidden_size)   # (hidden, input)
    w_u, b_u = _init_linear_params(k_u, hidden_size, input_size)   # (input, hidden)

    # Hoisted once, outside the per-call hot path.
    wd_t, bd, wu_t, bu = prepare_adapter_params(w_d, b_d, w_u, b_u)

    # Case 1: evenly divisible M.
    y = jax.block_until_ready(bottleneck_linear_adapter(x, wd_t, bd, wu_t, bu))
    y_ref = _reference(x, w_d, b_d, w_u, b_u)
    assert y.shape == x.shape
    assert jnp.allclose(y, y_ref, atol=1e-4, rtol=1e-4)

    # Case 2: ragged M (3*5 = 15 rows) exercises the masked trailing block.
    x2 = jax.random.normal(k_x, (3, 5, input_size), jnp.float32)
    y2 = jax.block_until_ready(bottleneck_linear_adapter(x2, wd_t, bd, wu_t, bu))
    y2_ref = _reference(x2, w_d, b_d, w_u, b_u)
    assert y2.shape == x2.shape
    assert jnp.allclose(y2, y2_ref, atol=1e-4, rtol=1e-4)

    print("KERNEL_OK")
</pallas_src>

<mosaic_0001>
module attributes {stable_mosaic.version = 11 : i64} {
  func.func @_adapter_kernel(%arg0: i32, %arg1: memref<16x128xf32, #tpu.memory_space<vmem>>, %arg2: memref<128x32xf32, #tpu.memory_space<vmem>>, %arg3: memref<1x32xf32, #tpu.memory_space<vmem>>, %arg4: memref<32x128xf32, #tpu.memory_space<vmem>>, %arg5: memref<1x128xf32, #tpu.memory_space<vmem>>, %arg6: memref<16x128xf32, #tpu.memory_space<vmem>>) attributes {dimension_semantics = [#tpu.dimension_semantics<parallel>], iteration_bounds = array<i64: 1>, scalar_prefetch = 0 : i64, scratch_operands = 0 : i64, tpu.core_type = #tpu.core_type<tc>, window_params = [{transform_indices = @transform_0, window_bounds = array<i64: 16, 128>}, {pipeline_mode = #tpu.pipeline_mode<synchronous>, transform_indices = @transform_1, window_bounds = array<i64: 128, 32>}, {pipeline_mode = #tpu.pipeline_mode<synchronous>, transform_indices = @transform_2, window_bounds = array<i64: 1, 32>}, {pipeline_mode = #tpu.pipeline_mode<synchronous>, transform_indices = @transform_3, window_bounds = array<i64: 32, 128>}, {pipeline_mode = #tpu.pipeline_mode<synchronous>, transform_indices = @transform_4, window_bounds = array<i64: 1, 128>}, {transform_indices = @transform_5, window_bounds = array<i64: 16, 128>}]} {
    %c0 = arith.constant 0 : index
    %c0_0 = arith.constant 0 : index
    %0 = vector.load %arg1[%c0, %c0_0] : memref<16x128xf32, #tpu.memory_space<vmem>>, vector<16x128xf32>
    %c0_1 = arith.constant 0 : index
    %c0_2 = arith.constant 0 : index
    %1 = vector.load %arg2[%c0_1, %c0_2] : memref<128x32xf32, #tpu.memory_space<vmem>>, vector<128x32xf32>
    %cst = arith.constant dense<0.000000e+00> : vector<16x32xf32>
    %2 = tpu.matmul %0, %1, %cst {dimension_numbers = #tpu.dot_dimension_numbers<[1], [0], [0], [1], [0, 0, 1, 1], [], []>} : vector<16x128xf32>, vector<128x32xf32>, vector<16x32xf32> -> vector<16x32xf32>
    %c0_3 = arith.constant 0 : index
    %c0_4 = arith.constant 0 : index
    %3 = vector.load %arg3[%c0_3, %c0_4] : memref<1x32xf32, #tpu.memory_space<vmem>>, vector<1x32xf32>
    %4 = vector.broadcast %3 : vector<1x32xf32> to vector<16x32xf32>
    %5 = arith.addf %2, %4 : vector<16x32xf32>
    %cst_5 = arith.constant 0.000000e+00 : f32
    %6 = vector.broadcast %cst_5 : f32 to vector<16x32xf32>
    %7 = arith.maximumf %5, %6 : vector<16x32xf32>
    %c0_6 = arith.constant 0 : index
    %c0_7 = arith.constant 0 : index
    %8 = vector.load %arg4[%c0_6, %c0_7] : memref<32x128xf32, #tpu.memory_space<vmem>>, vector<32x128xf32>
    %cst_8 = arith.constant dense<0.000000e+00> : vector<16x128xf32>
    %9 = tpu.matmul %7, %8, %cst_8 {dimension_numbers = #tpu.dot_dimension_numbers<[1], [0], [0], [1], [0, 0, 1, 1], [], []>} : vector<16x32xf32>, vector<32x128xf32>, vector<16x128xf32> -> vector<16x128xf32>
    %c0_9 = arith.constant 0 : index
    %c0_10 = arith.constant 0 : index
    %10 = vector.load %arg5[%c0_9, %c0_10] : memref<1x128xf32, #tpu.memory_space<vmem>>, vector<1x128xf32>
    %11 = vector.broadcast %10 : vector<1x128xf32> to vector<16x128xf32>
    %12 = arith.addf %9, %11 : vector<16x128xf32>
    %c0_11 = arith.constant 0 : index
    %c0_12 = arith.constant 0 : index
    %13 = vector.load %arg6[%c0_11, %c0_12] : memref<16x128xf32, #tpu.memory_space<vmem>>, vector<16x128xf32>
    tpu.vector_store %arg6[%c0_11, %c0_12], %12 {strides = array<i32>} : memref<16x128xf32, #tpu.memory_space<vmem>>, vector<16x128xf32>,
    return
  }
  func.func @transform_0(%arg0: i32) -> (i32, i32) {
    %c0_i32 = arith.constant 0 : i32
    %c0_i32_0 = arith.constant 0 : i32
    return %arg0, %c0_i32 : i32, i32
  }
  func.func @transform_1(%arg0: i32) -> (i32, i32) {
    %c0_i32 = arith.constant 0 : i32
    %c0_i32_0 = arith.constant 0 : i32
    %c0_i32_1 = arith.constant 0 : i32
    return %c0_i32, %c0_i32_0 : i32, i32
  }
  func.func @transform_2(%arg0: i32) -> (i32, i32) {
    %c0_i32 = arith.constant 0 : i32
    %c0_i32_0 = arith.constant 0 : i32
    %c0_i32_1 = arith.constant 0 : i32
    return %c0_i32, %c0_i32_0 : i32, i32
  }
  func.func @transform_3(%arg0: i32) -> (i32, i32) {
    %c0_i32 = arith.constant 0 : i32
    %c0_i32_0 = arith.constant 0 : i32
    %c0_i32_1 = arith.constant 0 : i32
    return %c0_i32, %c0_i32_0 : i32, i32
  }
  func.func @transform_4(%arg0: i32) -> (i32, i32) {
    %c0_i32 = arith.constant 0 : i32
    %c0_i32_0 = arith.constant 0 : i32
    %c0_i32_1 = arith.constant 0 : i32
    return %c0_i32, %c0_i32_0 : i32, i32
  }
  func.func @transform_5(%arg0: i32) -> (i32, i32) {
    %c0_i32 = arith.constant 0 : i32
    %c0_i32_0 = arith.constant 0 : i32
    return %arg0, %c0_i32 : i32, i32
  }
}

</mosaic_0001>

<bundles_post_ra>
// kernel: bottleneck_linear_adapter.1
= control target key start
LH: loop header
LB: loop body
LE: loop exit
PB: predicated region body
PF: predicated region fallthrough
CT: control target
= control target key end

     0   :  { %s283_s0 = inlined_call_operand.vmem [shape: f32[16,128], index: 0, kind: input, shape index: {}]   ;;  %s284_s1 = inlined_call_operand.vmem [shape: f32[128,32], index: 1, kind: input, shape index: {}]   ;;  %s285_s2 = inlined_call_operand.vmem [shape: f32[1,32], index: 2, kind: input, shape index: {}]   ;;  %s286_s3 = inlined_call_operand.vmem [shape: f32[32,128], index: 3, kind: input, shape index: {}]   ;;  %s287_s4 = inlined_call_operand.vmem [shape: f32[1,128], index: 4, kind: input, shape index: {}]   ;;  %s288_s5 = inlined_call_operand.hbm [shape: f32[16,128], index: 5, kind: output, shape index: {}]  }
   0x1   :  { %v38_v0 = vld [vmem:[%s284_s1 + $0x78] sm:$0xff]  ;;  %v37_v1 = vld [vmem:[%s284_s1 + $0x70] sm:$0xff]  ;;  %v36_v2 = vld [vmem:[%s284_s1 + $0x68] sm:$0xff] }
   0x2   :  { %43 = vmatpush.msra.mxu0 %v38_v0  ;;  %128 = vmatpush.msra.mxu2 %v38_v0  ;;  %v35_v3 = vld [vmem:[%s284_s1 + $0x60] sm:$0xff]  ;;  %v34_v4 = vld [vmem:[%s284_s1 + $0x58] sm:$0xff] }
   0x3   :  { %v71_v5 = vld [vmem:[%s286_s3 + $0x18] sm:$0xff] }
   0x4   :  { %44 = vmatpush.msra.mxu0 %v37_v1  ;;  %129 = vmatpush.msra.mxu2 %v37_v1 }
   0x6   :  { %45 = vmatpush.msra.mxu0 %v36_v2  ;;  %130 = vmatpush.msra.mxu2 %v36_v2 }
   0x8   :  { %46 = vmatpush.msra.mxu0 %v35_v3  ;;  %131 = vmatpush.msra.mxu2 %v35_v3 }
   0x9   :  { %10 = vsyncpa [#allocation3], 0  ;;  %v33_v6 = vld [vmem:[%s284_s1 + $0x50] sm:$0xff]  ;;  %95 = vmatpush.msra.mxu1 %v71_v5  ;;  %v32_v7 = vld [vmem:[%s284_s1 + $0x48] sm:$0xff]  ;;  %vm76_vm0 = vcmask 261120   ;;  %s114_s16 = sshll.u32 %s288_s5, 4  ;;  %s115_s16 = int_to_ptr.hbm [resolvable:$true] %s114_s16 }
   0xa   :  { %47 = vmatpush.msra.mxu0 %v34_v4  ;;  %132 = vmatpush.msra.mxu2 %v34_v4  ;;  %v31_v8 = vld [vmem:[%s284_s1 + $0x40] sm:$0xff]  ;;  %v30_v9 = vld [vmem:[%s284_s1 + $0x38] sm:$0xff]  ;;  %v29_v10 = vld [vmem:[%s284_s1 + $0x30] sm:$0xff]  ;;  %s176_s17 = smov 128   ;;  %s177_s18 = smov 8  }
   0xb   :  { %v28_v11 = vld [vmem:[%s284_s1 + $0x28] sm:$0xff]  ;;  %v27_v12 = vld [vmem:[%s284_s1 + $0x20] sm:$0xff]  ;;  %v26_v13 = vld [vmem:[%s284_s1 + $0x18] sm:$0xff] }
   0xc   :  { %48 = vmatpush.msra.mxu0 %v33_v6  ;;  %133 = vmatpush.msra.mxu2 %v33_v6  ;;  %v25_v14 = vld [vmem:[%s284_s1 + $0x10] sm:$0xff]  ;;  %v24_v15 = vld [vmem:[%s284_s1 + $0x8] sm:$0xff]  ;;  %v23_v16 = vld [vmem:[%s284_s1] sm:$0xff] }
   0xd   :  { %v21_v17 = vld [vmem:[%s283_s0] sm:$0xff]  ;;  %v22_v18 = vld [vmem:[%s283_s0 + $0x8] sm:$0xff]  ;;  %v70_v19 = vld [vmem:[%s286_s3 + $0x10] sm:$0xff] }
   0xe   :  { %49 = vmatpush.msra.mxu0 %v32_v7  ;;  %134 = vmatpush.msra.mxu2 %v32_v7  ;;  %v69_v20 = vld [vmem:[%s286_s3 + $0x8] sm:$0xff]  ;;  %v68_v21 = vld [vmem:[%s286_s3] sm:$0xff]  ;;  %s175_s3 = smov [#allocation2]  }
   0xf   :  { %96 = vmatpush.msra.mxu1 %v70_v19  ;;  %v147_v22 = vld [vmem:[%s285_s2] ss:$0 sm:$0xff]  ;;  %s112_s14 = sshll.u32 %s175_s3, 4  ;;  %s113_s14 = int_to_ptr.vmem [resolvable:$true] %s112_s14 }
  0x10   :  { %50 = vmatpush.msra.mxu0 %v31_v8  ;;  %135 = vmatpush.msra.mxu2 %v31_v8  ;;  %v148_v29 = vld [vmem:[%s287_s4] ss:$0 sm:$0xff] }
  0x11   :  { %97 = vmatpush.msra.mxu1 %v69_v20 }
  0x12   :  { %51 = vmatpush.msra.mxu0 %v30_v9  ;;  %136 = vmatpush.msra.mxu2 %v30_v9 }
  0x13   :  { %98 = vmatpush.msra.mxu1 %v68_v21 }
  0x14   :  { %52 = vmatpush.msra.mxu0 %v29_v10  ;;  %137 = vmatpush.msra.mxu2 %v29_v10 }
  0x16   :  { %53 = vmatpush.msra.mxu0 %v28_v11  ;;  %138 = vmatpush.msra.mxu2 %v28_v11 }
  0x18   :  { %54 = vmatpush.msra.mxu0 %v27_v12  ;;  %139 = vmatpush.msra.mxu2 %v27_v12 }
  0x1a   :  { %55 = vmatpush.msra.mxu0 %v26_v13  ;;  %140 = vmatpush.msra.mxu2 %v26_v13 }
  0x1c   :  { %56 = vmatpush.msra.mxu0 %v25_v14  ;;  %141 = vmatpush.msra.mxu2 %v25_v14 }
  0x1e   :  { %57 = vmatpush.msra.mxu0 %v24_v15  ;;  %142 = vmatpush.msra.mxu2 %v24_v15 }
  0x20   :  { %58 = vmatpush.msra.mxu0 %v23_v16  ;;  %143 = vmatpush.msra.mxu2 %v23_v16 }
  0x21   :  { %59 = vmatmul.f32.vlgmr.msra.gmra.mxu0 %v21_v17  ;;  %62 = vmatmul.f32.vlgmr.msra.gmra.mxu2 %v22_v18 }
  0x9e   :  { %v60_v23 = vpop.f32.mrf.mxu0 }
  0x9f   :  { %v61_v24 = vadd.f32 %v147_v22, %v60_v23 }
  0xa1   :  { %v66_v25 = vmax.f32 %v61_v24, 0.0 }
  0xa3   :  { %126 = vmatmul.msk.f32.vlgmr.msra.gmra.mxu1 %vm76_vm0, %v66_v25 }
  0xa4   :  { %v63_v26 = vpop.f32.mrf.mxu2 }
  0xa5   :  { %v64_v27 = vadd.f32 %v147_v22, %v63_v26 }
  0xa7   :  { %v67_v28 = vmax.f32 %v64_v27, 0.0 }
  0xab   :  { %127 = vmatmul.msk.f32.gmra.mxu1 %vm76_vm0, %v67_v28 }
 0x120   :  { %v100_v30 = vpop.f32.mrf.mxu1 }
 0x121   :  { %v101_v31 = vadd.f32 %v148_v29, %v100_v30 }
 0x123   :  { %106 = vst [vmem:[#allocation2] sm:$0xff] %v101_v31 }
 0x128   :  { %v103_v32 = vpop.f32.mrf.mxu1 }
 0x129   :  { %v104_v33 = vadd.f32 %v148_v29, %v103_v32 }
 0x12b   :  { %107 = vst [vmem:[#allocation2 + $0x8] sm:$0xff] %v104_v33 }
 0x12c   :  { %120 = dma.vmem_to_hbm [thread:$0]  %s113_s14, 256, %s115_s16, [#allocation3], %s176_s17, %s176_s17, %s177_s18  }
 0x12d   :  { %173 = dma.done.wait [#allocation3], 256  }
 0x12e   :  { %174 = vsyncadd [#allocation3], 4294967040 }
 0x12f   :  { %125 = vsyncpa [#allocation3], 1 }

</bundles_post_ra>
